<compile_context>
chip_gen: v5e
topology: v5e:2x2
jax: 0.10.0
libtpu: 0.0.40
codegen_flags: <defaults>
</compile_context>

<pallas_src>
import math

import jax
import jax.numpy as jnp
from jax.experimental import pallas as pl
from jax.experimental.pallas import tpu as pltpu


def _gelu(x):
    # Exact (erf-based) GELU, matching torch.nn.GELU() default.
    return 0.5 * x * (1.0 + jax.lax.erf(x * (1.0 / math.sqrt(2.0))))


def _sigmoid(x):
    # exp goes to the EUP; exact reciprocal keeps the f32 path within 1e-5
    # of the reference (approx=True would perturb numerics).
    return pl.reciprocal(1.0 + jnp.exp(-x), approx=False)


def cross_gated_mlp_kernel(
    x1_ref, x2_ref,
    wf1_ref, bf1_ref,   # fused [w1a | wg1] (D, 2D), [b1a | bg1] (1, 2D)
    wf2_ref, bf2_ref,   # fused [w2a | wg2], [b2a | bg2]
    w1b_ref, b1b_ref,   # mlp_x1 second Linear (D, D), (1, D)
    w2b_ref, b2b_ref,   # mlp_x2 second Linear
    out_ref,
):
    D = w1b_ref.shape[0]

    # Fused first-Linear + gate matmul per input: N = 2D fills the MXU width.
    y1 = jnp.dot(x1_ref[...], wf1_ref[...],
                 preferred_element_type=jnp.float32) + bf1_ref[...]
    y2 = jnp.dot(x2_ref[...], wf2_ref[...],
                 preferred_element_type=jnp.float32) + bf2_ref[...]

    # Activation / gate split (EUP + VPU work overlaps the next MXU matmul).
    h1 = _gelu(y1[:, :D])
    g1 = _sigmoid(y1[:, D:])
    h2 = _gelu(y2[:, :D])
    g2 = _sigmoid(y2[:, D:])

    # Second Linear + GELU of each MLP (matmul in the weight dtype, f32 acc).
    h1 = _gelu(jnp.dot(h1.astype(w1b_ref.dtype), w1b_ref[...],
                       preferred_element_type=jnp.float32) + b1b_ref[...])
    h2 = _gelu(jnp.dot(h2.astype(w2b_ref.dtype), w2b_ref[...],
                       preferred_element_type=jnp.float32) + b2b_ref[...])

    # Cross gating: reuse g*h products (saves two VPU multiplies per element).
    t1 = g1 * h1
    t2 = g2 * h2
    cg1 = h1 - t1 + t2       # (1 - g1) * h1 + g2 * h2
    cg2 = h2 - t2 + t1       # (1 - g2) * h2 + g1 * h1

    # Single lane-dense (tm, 2D) store (== torch.cat([cg1, cg2], dim=1)).
    out_ref[...] = jnp.concatenate([cg1, cg2], axis=-1).astype(out_ref.dtype)


def _round_up(x, m):
    return ((x + m - 1) // m) * m


def _choose_tm(batch, tm, align):
    """Clamp the batch tile to the (aligned) batch; prefer >= 2 grid steps so
    v7x's two TensorCores both get work from the 'parallel' grid axis."""
    tm_eff = min(_round_up(tm, align), _round_up(batch, align))
    if _round_up(batch, tm_eff) == tm_eff and tm_eff > align:
        tm_eff = max(align, _round_up(tm_eff // 2, align))
    return tm_eff


def cross_gated_mlp(x1, x2, params, *, tm=256, compute_dtype=None):
    """x1, x2: (B, D).  params: dict of pre-transposed (in, out) weights and
    (1, D) biases.  Returns (B, 2*D) = concat([cross_gated_x1, cross_gated_x2], 1).

    compute_dtype: dtype of the matmul operands (e.g. jnp.bfloat16 for MXU-peak
    throughput).  Accumulation and activation/gating math stay in float32.
    """
    B, D = x1.shape
    assert x2.shape == (B, D)
    out_dtype = x1.dtype
    w_dtype = jnp.dtype(compute_dtype) if compute_dtype is not None else jnp.dtype(x1.dtype)
    f32 = jnp.float32

    # Fuse first-layer + gate weights -> one N=2D matmul per input.
    wf1 = jnp.concatenate([params["w1a"], params["wg1"]], axis=1).astype(w_dtype)
    wf2 = jnp.concatenate([params["w2a"], params["wg2"]], axis=1).astype(w_dtype)
    bf1 = jnp.concatenate([params["b1a"], params["bg1"]], axis=1).astype(f32)
    bf2 = jnp.concatenate([params["b2a"], params["bg2"]], axis=1).astype(f32)
    w1b = params["w1b"].astype(w_dtype)
    w2b = params["w2b"].astype(w_dtype)
    b1b = params["b1b"].astype(f32)
    b2b = params["b2b"].astype(f32)

    x1c = x1.astype(w_dtype)
    x2c = x2.astype(w_dtype)

    # Sublane alignment: 8 rows (f32), 16 (bf16), 32 (8-bit).
    align = 8 * max(1, 4 // w_dtype.itemsize)
    tm_eff = _choose_tm(B, tm, align)
    B_pad = _round_up(B, tm_eff)
    if B_pad != B:
        pad = ((0, B_pad - B), (0, 0))
        x1c = jnp.pad(x1c, pad)
        x2c = jnp.pad(x2c, pad)
    grid = (B_pad // tm_eff,)

    # Weights / biases never change across the grid -> single-buffer them.
    const = pl.Buffered(buffer_count=1)
    wfull_spec = pl.BlockSpec((D, 2 * D), lambda i: (0, 0), pipeline_mode=const)
    whid_spec = pl.BlockSpec((D, D), lambda i: (0, 0), pipeline_mode=const)
    bfull_spec = pl.BlockSpec((1, 2 * D), lambda i: (0, 0), pipeline_mode=const)
    bhid_spec = pl.BlockSpec((1, D), lambda i: (0, 0), pipeline_mode=const)
    x_spec = pl.BlockSpec((tm_eff, D), lambda i: (i, 0))
    out_spec = pl.BlockSpec((tm_eff, 2 * D), lambda i: (i, 0))

    in_specs = [
        x_spec, x_spec,
        wfull_spec, bfull_spec,
        wfull_spec, bfull_spec,
        whid_spec, bhid_spec,
        whid_spec, bhid_spec,
    ]

    # VMEM budget: resident single-buffered weights + double-buffered x / out.
    # TODO(synk): for very large input_size (resident weights > ~48 MiB, e.g.
    # D >~ 1.4K in f32) tile the weight K/N dims with a reduction grid axis
    # instead of keeping all weights resident (required on v7x's 64 MiB VMEM).
    w_bytes = (2 * D * 2 * D + 2 * D * D) * w_dtype.itemsize + 6 * D * 4
    io_bytes = (2 * 2 * tm_eff * D * w_dtype.itemsize
                + 2 * tm_eff * 2 * D * jnp.dtype(out_dtype).itemsize)
    vmem_limit = int(1.5 * (w_bytes + io_bytes)) + (8 << 20)
    vmem_limit = min(max(vmem_limit, 32 << 20), 64 << 20)

    cost = pl.CostEstimate(
        flops=2 * B_pad * D * D * 6,
        transcendentals=6 * B_pad * D,
        bytes_accessed=int(w_bytes
                           + 2 * B_pad * D * w_dtype.itemsize
                           + B_pad * 2 * D * jnp.dtype(out_dtype).itemsize),
    )

    fn = pl.pallas_call(
        cross_gated_mlp_kernel,
        out_shape=jax.ShapeDtypeStruct((B_pad, 2 * D), out_dtype),
        grid_spec=pltpu.PrefetchScalarGridSpec(
            num_scalar_prefetch=0,
            grid=grid,
            in_specs=in_specs,
            out_specs=out_spec,
        ),
        compiler_params=pltpu.CompilerParams(
            dimension_semantics=("parallel",),
            vmem_limit_bytes=vmem_limit,
        ),
        cost_estimate=cost,
    )
    out = fn(x1c, x2c, wf1, bf1, wf2, bf2, w1b, b1b, w2b, b2b)
    return out[:B] if B_pad != B else out


def init_params(key, D, dtype=jnp.float32):
    """Deterministic synthetic init mimicking nn.Linear shapes.
    PyTorch Linear weight is (out, in); we store the transpose (in, out)
    so the kernel does x @ W + b.  Biases stored as (1, D)."""
    names = ["w1a", "w1b", "w2a", "w2b", "wg1", "wg2"]
    keys = jax.random.split(key, 2 * len(names))
    bound = 1.0 / math.sqrt(D)
    params = {}
    for i, n in enumerate(names):
        w = jax.random.uniform(keys[2 * i], (D, D), dtype, -bound, bound)
        b = jax.random.uniform(keys[2 * i + 1], (1, D), dtype, -bound, bound)
        params[n] = w                      # already (in, out) = transpose of torch layout
        params["b" + n[1:]] = b
    return params


def reference(x1, x2, p):
    def gelu(x):
        return 0.5 * x * (1.0 + jax.lax.erf(x / math.sqrt(2.0)))

    def sig(x):
        return 1.0 / (1.0 + jnp.exp(-x))

    h1 = gelu(gelu(x1 @ p["w1a"] + p["b1a"]) @ p["w1b"] + p["b1b"])
    h2 = gelu(gelu(x2 @ p["w2a"] + p["b2a"]) @ p["w2b"] + p["b2b"])
    g1 = sig(x1 @ p["wg1"] + p["bg1"])
    g2 = sig(x2 @ p["wg2"] + p["bg2"])
    cg1 = (1 - g1) * h1 + g2 * h2
    cg2 = (1 - g2) * h2 + g1 * h1
    return jnp.concatenate([cg1, cg2], axis=1)


if __name__ == "__main__":
    B, D = 16, 128  # batch, input_size (lane-aligned feature dim)
    key = jax.random.PRNGKey(0)
    kx1, kx2, kp = jax.random.split(key, 3)
    x1 = jax.random.normal(kx1, (B, D), jnp.float32)
    x2 = jax.random.normal(kx2, (B, D), jnp.float32)
    params = init_params(kp, D)

    ref = reference(x1, x2, params)

    # f32 path: matches the PyTorch module semantics tightly.
    out = jax.block_until_ready(cross_gated_mlp(x1, x2, params))
    assert out.shape == (B, 2 * D)
    assert jnp.allclose(out, ref, atol=1e-5, rtol=1e-5)

    # bf16-matmul path (MXU-peak dtype, f32 accumulation) -> looser tolerance.
    out_bf16 = jax.block_until_ready(
        cross_gated_mlp(x1, x2, params, compute_dtype=jnp.bfloat16))
    assert out_bf16.shape == (B, 2 * D)
    assert jnp.allclose(out_bf16, ref, atol=5e-2, rtol=5e-2)

    print("KERNEL_OK")
</pallas_src>

<mosaic_0001>
module attributes {stable_mosaic.version = 11 : i64} {
  func.func @cross_gated_mlp_kernel(%arg0: i32, %arg1: memref<8x128xf32, #tpu.memory_space<vmem>>, %arg2: memref<8x128xf32, #tpu.memory_space<vmem>>, %arg3: memref<128x256xf32, #tpu.memory_space<vmem>>, %arg4: memref<1x256xf32, #tpu.memory_space<vmem>>, %arg5: memref<128x256xf32, #tpu.memory_space<vmem>>, %arg6: memref<1x256xf32, #tpu.memory_space<vmem>>, %arg7: memref<128x128xf32, #tpu.memory_space<vmem>>, %arg8: memref<1x128xf32, #tpu.memory_space<vmem>>, %arg9: memref<128x128xf32, #tpu.memory_space<vmem>>, %arg10: memref<1x128xf32, #tpu.memory_space<vmem>>, %arg11: memref<8x256xf32, #tpu.memory_space<vmem>>) attributes {dimension_semantics = [#tpu.dimension_semantics<parallel>], iteration_bounds = array<i64: 2>, scalar_prefetch = 0 : i64, scratch_operands = 0 : i64, tpu.core_type = #tpu.core_type<tc>, window_params = [{transform_indices = @transform_0, window_bounds = array<i64: 8, 128>}, {transform_indices = @transform_1, window_bounds = array<i64: 8, 128>}, {pipeline_mode = #tpu.pipeline_mode<synchronous>, transform_indices = @transform_2, window_bounds = array<i64: 128, 256>}, {pipeline_mode = #tpu.pipeline_mode<synchronous>, transform_indices = @transform_3, window_bounds = array<i64: 1, 256>}, {pipeline_mode = #tpu.pipeline_mode<synchronous>, transform_indices = @transform_4, window_bounds = array<i64: 128, 256>}, {pipeline_mode = #tpu.pipeline_mode<synchronous>, transform_indices = @transform_5, window_bounds = array<i64: 1, 256>}, {pipeline_mode = #tpu.pipeline_mode<synchronous>, transform_indices = @transform_6, window_bounds = array<i64: 128, 128>}, {pipeline_mode = #tpu.pipeline_mode<synchronous>, transform_indices = @transform_7, window_bounds = array<i64: 1, 128>}, {pipeline_mode = #tpu.pipeline_mode<synchronous>, transform_indices = @transform_8, window_bounds = array<i64: 128, 128>}, {pipeline_mode = #tpu.pipeline_mode<synchronous>, transform_indices = @transform_9, window_bounds = array<i64: 1, 128>}, {transform_indices = @transform_10, window_bounds = array<i64: 8, 256>}]} {
    %c0 = arith.constant 0 : index
    %c0_0 = arith.constant 0 : index
    %0 = vector.load %arg1[%c0, %c0_0] : memref<8x128xf32, #tpu.memory_space<vmem>>, vector<8x128xf32>
    %c0_1 = arith.constant 0 : index
    %c0_2 = arith.constant 0 : index
    %1 = vector.load %arg3[%c0_1, %c0_2] : memref<128x256xf32, #tpu.memory_space<vmem>>, vector<128x256xf32>
    %cst = arith.constant dense<0.000000e+00> : vector<8x256xf32>
    %2 = tpu.matmul %0, %1, %cst {dimension_numbers = #tpu.dot_dimension_numbers<[1], [0], [0], [1], [0, 0, 1, 1], [], []>} : vector<8x128xf32>, vector<128x256xf32>, vector<8x256xf32> -> vector<8x256xf32>
    %c0_3 = arith.constant 0 : index
    %c0_4 = arith.constant 0 : index
    %3 = vector.load %arg4[%c0_3, %c0_4] : memref<1x256xf32, #tpu.memory_space<vmem>>, vector<1x256xf32>
    %4 = vector.broadcast %3 : vector<1x256xf32> to vector<8x256xf32>
    %5 = arith.addf %2, %4 : vector<8x256xf32>
    %c0_5 = arith.constant 0 : index
    %c0_6 = arith.constant 0 : index
    %6 = vector.load %arg2[%c0_5, %c0_6] : memref<8x128xf32, #tpu.memory_space<vmem>>, vector<8x128xf32>
    %c0_7 = arith.constant 0 : index
    %c0_8 = arith.constant 0 : index
    %7 = vector.load %arg5[%c0_7, %c0_8] : memref<128x256xf32, #tpu.memory_space<vmem>>, vector<128x256xf32>
    %cst_9 = arith.constant dense<0.000000e+00> : vector<8x256xf32>
    %8 = tpu.matmul %6, %7, %cst_9 {dimension_numbers = #tpu.dot_dimension_numbers<[1], [0], [0], [1], [0, 0, 1, 1], [], []>} : vector<8x128xf32>, vector<128x256xf32>, vector<8x256xf32> -> vector<8x256xf32>
    %c0_10 = arith.constant 0 : index
    %c0_11 = arith.constant 0 : index
    %9 = vector.load %arg6[%c0_10, %c0_11] : memref<1x256xf32, #tpu.memory_space<vmem>>, vector<1x256xf32>
    %10 = vector.broadcast %9 : vector<1x256xf32> to vector<8x256xf32>
    %11 = arith.addf %8, %10 : vector<8x256xf32>
    %12 = vector.extract_strided_slice %5 {offsets = [0, 0], sizes = [8, 128], strides = [1, 1]} : vector<8x256xf32> to vector<8x128xf32>
    %cst_12 = arith.constant 5.000000e-01 : f32
    %13 = vector.broadcast %cst_12 : f32 to vector<8x128xf32>
    %14 = arith.mulf %13, %12 : vector<8x128xf32>
    %cst_13 = arith.constant 0.707106769 : f32
    %15 = vector.broadcast %cst_13 : f32 to vector<8x128xf32>
    %16 = arith.mulf %12, %15 : vector<8x128xf32>
    %17 = math.erf %16 : vector<8x128xf32>
    %cst_14 = arith.constant 1.000000e+00 : f32
    %18 = vector.broadcast %cst_14 : f32 to vector<8x128xf32>
    %19 = arith.addf %18, %17 : vector<8x128xf32>
    %20 = arith.mulf %14, %19 : vector<8x128xf32>
    %21 = vector.extract_strided_slice %5 {offsets = [0, 128], sizes = [8, 128], strides = [1, 1]} : vector<8x256xf32> to vector<8x128xf32>
    %cst_15 = arith.constant 0.000000e+00 : f32
    %22 = vector.broadcast %cst_15 : f32 to vector<8x128xf32>
    %23 = arith.subf %22, %21 : vector<8x128xf32>
    %24 = math.exp %23 : vector<8x128xf32>
    %cst_16 = arith.constant 1.000000e+00 : f32
    %25 = vector.broadcast %cst_16 : f32 to vector<8x128xf32>
    %26 = arith.addf %25, %24 : vector<8x128xf32>
    %27 = tpu.reciprocal %26 : vector<8x128xf32> -> vector<8x128xf32>
    %28 = vector.extract_strided_slice %11 {offsets = [0, 0], sizes = [8, 128], strides = [1, 1]} : vector<8x256xf32> to vector<8x128xf32>
    %cst_17 = arith.constant 5.000000e-01 : f32
    %29 = vector.broadcast %cst_17 : f32 to vector<8x128xf32>
    %30 = arith.mulf %29, %28 : vector<8x128xf32>
    %cst_18 = arith.constant 0.707106769 : f32
    %31 = vector.broadcast %cst_18 : f32 to vector<8x128xf32>
    %32 = arith.mulf %28, %31 : vector<8x128xf32>
    %33 = math.erf %32 : vector<8x128xf32>
    %cst_19 = arith.constant 1.000000e+00 : f32
    %34 = vector.broadcast %cst_19 : f32 to vector<8x128xf32>
    %35 = arith.addf %34, %33 : vector<8x128xf32>
    %36 = arith.mulf %30, %35 : vector<8x128xf32>
    %37 = vector.extract_strided_slice %11 {offsets = [0, 128], sizes = [8, 128], strides = [1, 1]} : vector<8x256xf32> to vector<8x128xf32>
    %cst_20 = arith.constant 0.000000e+00 : f32
    %38 = vector.broadcast %cst_20 : f32 to vector<8x128xf32>
    %39 = arith.subf %38, %37 : vector<8x128xf32>
    %40 = math.exp %39 : vector<8x128xf32>
    %cst_21 = arith.constant 1.000000e+00 : f32
    %41 = vector.broadcast %cst_21 : f32 to vector<8x128xf32>
    %42 = arith.addf %41, %40 : vector<8x128xf32>
    %43 = tpu.reciprocal %42 : vector<8x128xf32> -> vector<8x128xf32>
    %c0_22 = arith.constant 0 : index
    %c0_23 = arith.constant 0 : index
    %44 = vector.load %arg7[%c0_22, %c0_23] : memref<128x128xf32, #tpu.memory_space<vmem>>, vector<128x128xf32>
    %cst_24 = arith.constant dense<0.000000e+00> : vector<8x128xf32>
    %45 = tpu.matmul %20, %44, %cst_24 {dimension_numbers = #tpu.dot_dimension_numbers<[1], [0], [0], [1], [0, 0, 1, 1], [], []>} : vector<8x128xf32>, vector<128x128xf32>, vector<8x128xf32> -> vector<8x128xf32>
    %c0_25 = arith.constant 0 : index
    %c0_26 = arith.constant 0 : index
    %46 = vector.load %arg8[%c0_25, %c0_26] : memref<1x128xf32, #tpu.memory_space<vmem>>, vector<1x128xf32>
    %47 = vector.broadcast %46 : vector<1x128xf32> to vector<8x128xf32>
    %48 = arith.addf %45, %47 : vector<8x128xf32>
    %cst_27 = arith.constant 5.000000e-01 : f32
    %49 = vector.broadcast %cst_27 : f32 to vector<8x128xf32>
    %50 = arith.mulf %49, %48 : vector<8x128xf32>
    %cst_28 = arith.constant 0.707106769 : f32
    %51 = vector.broadcast %cst_28 : f32 to vector<8x128xf32>
    %52 = arith.mulf %48, %51 : vector<8x128xf32>
    %53 = math.erf %52 : vector<8x128xf32>
    %cst_29 = arith.constant 1.000000e+00 : f32
    %54 = vector.broadcast %cst_29 : f32 to vector<8x128xf32>
    %55 = arith.addf %54, %53 : vector<8x128xf32>
    %56 = arith.mulf %50, %55 : vector<8x128xf32>
    %c0_30 = arith.constant 0 : index
    %c0_31 = arith.constant 0 : index
    %57 = vector.load %arg9[%c0_30, %c0_31] : memref<128x128xf32, #tpu.memory_space<vmem>>, vector<128x128xf32>
    %cst_32 = arith.constant dense<0.000000e+00> : vector<8x128xf32>
    %58 = tpu.matmul %36, %57, %cst_32 {dimension_numbers = #tpu.dot_dimension_numbers<[1], [0], [0], [1], [0, 0, 1, 1], [], []>} : vector<8x128xf32>, vector<128x128xf32>, vector<8x128xf32> -> vector<8x128xf32>
    %c0_33 = arith.constant 0 : index
    %c0_34 = arith.constant 0 : index
    %59 = vector.load %arg10[%c0_33, %c0_34] : memref<1x128xf32, #tpu.memory_space<vmem>>, vector<1x128xf32>
    %60 = vector.broadcast %59 : vector<1x128xf32> to vector<8x128xf32>
    %61 = arith.addf %58, %60 : vector<8x128xf32>
    %cst_35 = arith.constant 5.000000e-01 : f32
    %62 = vector.broadcast %cst_35 : f32 to vector<8x128xf32>
    %63 = arith.mulf %62, %61 : vector<8x128xf32>
    %cst_36 = arith.constant 0.707106769 : f32
    %64 = vector.broadcast %cst_36 : f32 to vector<8x128xf32>
    %65 = arith.mulf %61, %64 : vector<8x128xf32>
    %66 = math.erf %65 : vector<8x128xf32>
    %cst_37 = arith.constant 1.000000e+00 : f32
    %67 = vector.broadcast %cst_37 : f32 to vector<8x128xf32>
    %68 = arith.addf %67, %66 : vector<8x128xf32>
    %69 = arith.mulf %63, %68 : vector<8x128xf32>
    %70 = arith.mulf %27, %56 : vector<8x128xf32>
    %71 = arith.mulf %43, %69 : vector<8x128xf32>
    %72 = arith.subf %56, %70 : vector<8x128xf32>
    %73 = arith.addf %72, %71 : vector<8x128xf32>
    %74 = arith.subf %69, %71 : vector<8x128xf32>
    %75 = arith.addf %74, %70 : vector<8x128xf32>
    %76 = tpu.concatenate %73, %75 in 1 : vector<8x128xf32>, vector<8x128xf32> -> vector<8x256xf32>
    %c0_38 = arith.constant 0 : index
    %c0_39 = arith.constant 0 : index
    %77 = vector.load %arg11[%c0_38, %c0_39] : memref<8x256xf32, #tpu.memory_space<vmem>>, vector<8x256xf32>
    tpu.vector_store %arg11[%c0_38, %c0_39], %76 {strides = array<i32>} : memref<8x256xf32, #tpu.memory_space<vmem>>, vector<8x256xf32>,
    return
  }
  func.func @transform_0(%arg0: i32) -> (i32, i32) {
    %c0_i32 = arith.constant 0 : i32
    %c0_i32_0 = arith.constant 0 : i32
    return %arg0, %c0_i32 : i32, i32
  }
  func.func @transform_1(%arg0: i32) -> (i32, i32) {
    %c0_i32 = arith.constant 0 : i32
    %c0_i32_0 = arith.constant 0 : i32
    return %arg0, %c0_i32 : i32, i32
  }
  func.func @transform_2(%arg0: i32) -> (i32, i32) {
    %c0_i32 = arith.constant 0 : i32
    %c0_i32_0 = arith.constant 0 : i32
    %c0_i32_1 = arith.constant 0 : i32
    return %c0_i32, %c0_i32_0 : i32, i32
  }
  func.func @transform_3(%arg0: i32) -> (i32, i32) {
    %c0_i32 = arith.constant 0 : i32
    %c0_i32_0 = arith.constant 0 : i32
    %c0_i32_1 = arith.constant 0 : i32
    return %c0_i32, %c0_i32_0 : i32, i32
  }
  func.func @transform_4(%arg0: i32) -> (i32, i32) {
    %c0_i32 = arith.constant 0 : i32
    %c0_i32_0 = arith.constant 0 : i32
    %c0_i32_1 = arith.constant 0 : i32
    return %c0_i32, %c0_i32_0 : i32, i32
  }
  func.func @transform_5(%arg0: i32) -> (i32, i32) {
    %c0_i32 = arith.constant 0 : i32
    %c0_i32_0 = arith.constant 0 : i32
    %c0_i32_1 = arith.constant 0 : i32
    return %c0_i32, %c0_i32_0 : i32, i32
  }
  func.func @transform_6(%arg0: i32) -> (i32, i32) {
    %c0_i32 = arith.constant 0 : i32
    %c0_i32_0 = arith.constant 0 : i32
    %c0_i32_1 = arith.constant 0 : i32
    return %c0_i32, %c0_i32_0 : i32, i32
  }
  func.func @transform_7(%arg0: i32) -> (i32, i32) {
    %c0_i32 = arith.constant 0 : i32
    %c0_i32_0 = arith.constant 0 : i32
    %c0_i32_1 = arith.constant 0 : i32
    return %c0_i32, %c0_i32_0 : i32, i32
  }
  func.func @transform_8(%arg0: i32) -> (i32, i32) {
    %c0_i32 = arith.constant 0 : i32
    %c0_i32_0 = arith.constant 0 : i32
    %c0_i32_1 = arith.constant 0 : i32
    return %c0_i32, %c0_i32_0 : i32, i32
  }
  func.func @transform_9(%arg0: i32) -> (i32, i32) {
    %c0_i32 = arith.constant 0 : i32
    %c0_i32_0 = arith.constant 0 : i32
    %c0_i32_1 = arith.constant 0 : i32
    return %c0_i32, %c0_i32_0 : i32, i32
  }
  func.func @transform_10(%arg0: i32) -> (i32, i32) {
    %c0_i32 = arith.constant 0 : i32
    %c0_i32_0 = arith.constant 0 : i32
    return %arg0, %c0_i32 : i32, i32
  }
}

</mosaic_0001>

<bundles_post_ra>
// kernel: tpu_custom_call.1
= control target key start
LH: loop header
LB: loop body
LE: loop exit
PB: predicated region body
PF: predicated region fallthrough
CT: control target
= control target key end

     0   :  { %s1887_s0 = inlined_call_operand.hbm [shape: f32[16,128], index: 0, kind: input, shape index: {}]   ;;  %s1888_s1 = inlined_call_operand.hbm [shape: f32[16,128], index: 1, kind: input, shape index: {}]   ;;  %s1889_s2 = inlined_call_operand.hbm [shape: f32[128,256], index: 2, kind: input, shape index: {}]   ;;  %s1890_s3 = inlined_call_operand.vmem [shape: f32[1,256], index: 3, kind: input, shape index: {}]   ;;  %s1891_s4 = inlined_call_operand.hbm [shape: f32[128,256], index: 4, kind: input, shape index: {}]   ;;  %s1892_s5 = inlined_call_operand.vmem [shape: f32[1,256], index: 5, kind: input, shape index: {}]   ;;  %s1893_s6 = inlined_call_operand.hbm [shape: f32[128,128], index: 6, kind: input, shape index: {}]   ;;  %s1894_s7 = inlined_call_operand.vmem [shape: f32[1,128], index: 7, kind: input, shape index: {}]   ;;  %s1895_s8 = inlined_call_operand.hbm [shape: f32[128,128], index: 8, kind: input, shape index: {}]   ;;  %s1896_s9 = inlined_call_operand.vmem [shape: f32[1,128], index: 9, kind: input, shape index: {}]   ;;  %s1897_s10 = inlined_call_operand.hbm [shape: f32[16,256], index: 10, kind: output, shape index: {}]  }
   0x1   :  { %1903 = sst [smem:[#allocation25_spill]] %s1889_s2 }
   0x2   :  { %1904 = sst [smem:[#allocation26_spill]] %s1891_s4 }
   0x3   :  { %1905 = sst [smem:[#allocation27_spill]] %s1893_s6 }
   0x4   :  { %1906 = sst [smem:[#allocation28_spill]] %s1895_s8 }
   0x5   :  { %15 = vsyncpa [#allocation3], 0 }
   0x6   :  { %17 = vsyncpa [#allocation3 + $0x1], 0 }
   0x7   :  { %18 = vsyncpa [#allocation6], 0 }
   0x8   :  { %20 = vsyncpa [#allocation6 + $0x1], 0 }
   0x9   :  { %21 = vsyncpa [#allocation9], 0 }
   0xa   :  { %22 = vsyncpa [#allocation12], 0 }
   0xb   :  { %23 = vsyncpa [#allocation4], 0 }
   0xc   :  { %25 = vsyncpa [#allocation4 + $0x1], 0  ;;  %s1558_s13 = smov 0   ;;  %s1560_s14 = smov 0  }
   0xd   :  { %s1562_s15 = smov 0   ;;  %s1564_s16 = smov 0  }
   0xe LB: > { %1907 = sst [smem:[#allocation20_spill]] %s1489_s15  ;;  %s1582_s20 = sadd.s32 4294967295, %s1493_s16   ;;  %s1493_s16 = sphi %s1564_s16, %s1930_s16   ;;  %s1489_s15 = sphi %s1562_s15, %s1932_s15   ;;  %s1485_s14 = sphi %s1560_s14, %s1934_s14   ;;  %s1481_s13 = sphi %s1558_s13, %s1933_s13  }
   0xf   : > { %1908 = sst [smem:[#allocation21_spill]] %s1493_s16  ;;  %p1089_p0 = scmp.ge.s32.totalorder %s1493_s16, 1 }
  0x10   : > { %s1909_s2 = sld [smem:[#allocation25_spill]]  ;;  %p52_p1 = scmp.eq.s32.totalorder %s1582_s20, 0 }
  0x11   : > { %p282_p2 = scmp.lt.s32.totalorder %s1493_s16, 3  ;;  %s1495_s22 = smov [#allocation7]  }
  0x12   : > { %s295_s23 = sshll.u32 %s1495_s22, 4  ;;  %s1911_s4 = sld [smem:[#allocation26_spill]]  ;;  %s296_s23 = int_to_ptr.vmem [resolvable:$true] %s295_s23 }
  0x13   : > { %p1587_p3 = pnand %p1089_p0, %p282_p2  ;;  %s1913_s6 = sld [smem:[#allocation27_spill]] }
  0x14   : > { %s1496_s11 = smov [#allocation8]   ;;  %s1497_s17 = smov 256  }
  0x15   : > { %p1139_p4 = pneg %p1587_p3  ;;  %s312_s12 = sshll.u32 %s1496_s11, 4  ;;  %s313_s12 = int_to_ptr.vmem [resolvable:$true] %s312_s12 }
  0x16   : > { %s293_s19 = sshll.u32 %s1909_s2, 4  ;;  %s1498_s18 = smov 16   ;;  %s294_s19 = int_to_ptr.hbm [resolvable:$true] %s293_s19 }
  0x17   : > { %p1599_p6 = pnand %p1139_p4, %p52_p1  ;;  %s1499_s22 = smov [#allocation10]  }
  0x18   : > { %s310_s26 = sshll.u32 %s1911_s4, 4  ;;  %s329_s24 = sshll.u32 %s1499_s22, 4  ;;  %s311_s26 = int_to_ptr.hbm [resolvable:$true] %s310_s26  ;;  %s330_s24 = int_to_ptr.vmem [resolvable:$true] %s329_s24 }
  0x19   : > { %s327_s30 = sshll.u32 %s1913_s6, 4  ;;  %s1914_s8 = sld [smem:[#allocation28_spill]]  ;;  %s328_s30 = int_to_ptr.hbm [resolvable:$true] %s327_s30 }
  0x1a   : > { %1142 = dma.hbm_to_vmem [thread:$0]  (!%p1599_p6), %s294_s19, 4096, %s296_s23, [#allocation6], %s1497_s17, %s1497_s17, %s1498_s18  }
  0x1b   : > { %1145 = dma.hbm_to_vmem [thread:$0]  (!%p1599_p6), %s311_s26, 4096, %s313_s12, [#allocation9], %s1497_s17, %s1497_s17, %s1498_s18  }
  0x1c   : > { %s1500_s19 = smov 128   ;;  %s1501_s23 = smov 8  }
  0x1d   : > { %1148 = dma.hbm_to_vmem [thread:$0]  (!%p1599_p6), %s328_s30, 2048, %s330_s24, [#allocation9], %s1500_s19, %s1500_s19, %s1501_s23  }
  0x1e   : > { %s1502_s26 = smov [#allocation11]   ;;  %s1088_s12 = sadd.s32 4294967294, %s1493_s16  }
  0x1f   : > { %s344_s29 = sshll.u32 %s1914_s8, 4  ;;  %s346_s11 = sshll.u32 %s1502_s26, 4  ;;  %s345_s29 = int_to_ptr.hbm [resolvable:$true] %s344_s29  ;;  %s347_s11 = int_to_ptr.vmem [resolvable:$true] %s346_s11 }
  0x20   : > { %1151 = dma.hbm_to_vmem [thread:$0]  (!%p1599_p6), %s345_s29, 2048, %s347_s11, [#allocation12], %s1500_s19, %s1500_s19, %s1501_s23  }
  0x21   : > { %s1619_s17 = sadd.s32 1, %s1493_s16   ;;  %s38_s22 = sadd.s32 1, %s1489_s15 }
  0x22   : > { %1915 = sst [smem:[#allocation22_spill]] %s1619_s17  ;;  %s35_s18 = ssub.s32 %s1493_s16, %s1619_s17 }
  0x23   : > { %p36_p7 = scmp.eq.s32.totalorder %s35_s18, 0  ;;  %p45_p8 = scmp.ne.s32.totalorder %s1489_s15, %s1485_s14 }
  0x24   : > { %p46_p9 = scmp.eq.s32.totalorder %s1493_s16, 0  ;;  %p51_p10 = scmp.ne.s32.totalorder %s1485_s14, %s1481_s13 }
  0x25   : > { %s1630_s30 = scalar_select %p36_p7, %s1489_s15, %s38_s22  }
  0x26   : > { %p1632_p11 = por %p46_p9, %p45_p8  ;;  %p1638_p12 = por %p52_p1, %p51_p10 }
  0x27   : > { %1916 = sst [smem:[#allocation23_spill]] %s1630_s30  ;;  %p269_p13 = scmp.eq.s32.totalorder %s1582_s20, 1 }
  0x28   : > { %p275_p0 = scmp.eq.s32.totalorder %s1088_s12, 1  ;;  %p1167_p2 = scmp.lt.s32.totalorder %s1493_s16, 2 }
  0x29   : > { %s363_s25 = sand.u32 1, %s1489_s15   ;;  %p1645_p4 = por %p269_p13, %p45_p8 }
  0x2a   : > { %p1649_p6 = por %p275_p0, %p51_p10  ;;  %s1653_s19 = sshll.u32 %s363_s25, 3 }
  0x2b   : > { %s1096_s23 = sshll.u32 %s1493_s16, 3  ;;  %s367_s22 = scalar_lea.vmem [#allocation2], %s1653_s19 }
  0x2c   : > { %s1920_s29 = scalar_select %p1649_p6, 1, 0 }
  0x2d   : > { %s371_s18 = scalar_lea.hbm %s1887_s0, %s1096_s23  ;;  %s375_s12 = sshll.u32 %s367_s22, 4  ;;  %s376_s12 = int_to_ptr.vmem [resolvable:$true] %s375_s12 }
  0x2e   : > { %1921 = sst [smem:[#allocation24_spill]] %s1920_s29  ;;  %s373_s2 = sshll.u32 %s371_s18, 4  ;;  %s374_s2 = int_to_ptr.hbm [resolvable:$true] %s373_s2 }
  0x2f   : > { %p1662_p7 = pnand %p1167_p2, %p1632_p11  ;;  %s390_s30 = scalar_lea.hbm %s1888_s1, %s1096_s23 }
  0x30   : > { %s382_s15 = sand.u32 1, %s1493_s16   ;;  %s364_s17 = scalar_lea.sflag [#allocation3], %s363_s25 }
  0x31   : > { %s1351_s26 = sshra.s32 %s374_s2, 4  ;;  %p1355_p9 = pneg %p1662_p7  ;;  %s1352_s26 = int_to_ptr.hbm [resolvable:$true] %s1351_s26 }
  0x32   : > { %s1353_s11 = scalar_lea.hbm %s1352_s26, 8  ;;  %s1358_s22 = scalar_lea.hbm %s1887_s0, 16 }
  0x33   : > { %p1354_p8 = scmp.ne.s32.totalorder %s1352_s26, %s1353_s11  ;;  %p1359_p13 = scmp.lt.s32.totalorder %s1352_s26, %s1887_s0 }
  0x34   : > { %p1360_p0 = scmp.lt.s32.totalorder %s1358_s22, %s1353_s11 }
  0x35   : > { %p1356_p10 = pnand %p1355_p9, %p1354_p8 }
  0x36   : > { %p1361_p2 = por %p1360_p0, %p1359_p13 }
  0x37   : > { %p1357_p11 = pneg %p1356_p10 }
  0x39   : > { %p1362_p5 = pnand %p1361_p2, %p1357_p11 }
  0x3b   : > { %1365 = shalt.err (!%p1362_p5)
}
  0x3c   : > { %1155 = dma.hbm_to_vmem [thread:$0]  (!%p1662_p7), %s374_s2, 128, %s376_s12, %s364_s17  }
  0x3d   : > { %s392_s25 = sshll.u32 %s390_s30, 4  ;;  %s386_s23 = scalar_lea.vmem [#allocation5], %s1653_s19  ;;  %s393_s25 = int_to_ptr.hbm [resolvable:$true] %s392_s25 }
  0x3e   : > { %s394_s16 = sshll.u32 %s386_s23, 4  ;;  %s383_s24 = scalar_lea.sflag [#allocation6], %s382_s15  ;;  %s395_s16 = int_to_ptr.vmem [resolvable:$true] %s394_s16 }
  0x3f   : > { %s1381_s18 = sshra.s32 %s393_s25, 4  ;;  %s1388_s22 = scalar_lea.hbm %s1888_s1, 16  ;;  %s1382_s18 = int_to_ptr.hbm [resolvable:$true] %s1381_s18 }
  0x40   : > { %s1383_s29 = scalar_lea.hbm %s1382_s18, 8  ;;  %p1389_p5 = scmp.lt.s32.totalorder %s1382_s18, %s1888_s1 }
  0x41   : > { %p1384_p8 = scmp.ne.s32.totalorder %s1382_s18, %s1383_s29  ;;  %p1390_p13 = scmp.lt.s32.totalorder %s1388_s22, %s1383_s29 }
  0x43   : > { %p1386_p10 = pnand %p1384_p8, %p1355_p9  ;;  %p1391_p0 = por %p1390_p13, %p1389_p5 }
  0x45   : > { %p1387_p11 = pneg %p1386_p10 }
  0x47   : > { %p1392_p2 = pnand %p1391_p0, %p1387_p11 }
  0x49   : > { %1395 = shalt.err (!%p1392_p2)
}
  0x4a   : > { %1158 = dma.hbm_to_vmem [thread:$0]  (!%p1662_p7), %s393_s25, 128, %s395_s16, %s383_s24  }
  0x4b   : > { %403 = sbr.rel (%p1587_p3) target bundleno = 496 (0x1f0), region = 60  ;;  %s1698_s15 = sand.u32 (!%p1587_p3), 1, %s1485_s14  }
  0x4c   : > { %s1100_s17 = sshll.u32 (!%p1587_p3), %s1698_s15, 3  ;;  %s406_s30 = scalar_lea.sflag (!%p1587_p3), [#allocation3], %s1698_s15 }
  0x4d   : > { %s1702_s19 = scalar_lea.vmem (!%p1587_p3), [#allocation2], %s1100_s17 }
  0x50   : > { %1456 = dma.done.wait (%p1638_p12), %s406_s30, 128  }
  0x51   : > { %1458 = vsyncadd (%p1638_p12), %s406_s30, 4294967168  ;;  %s415_s4 = sand.u32 1, %s1582_s20   ;;  %s1709_s21 = scalar_lea.vmem [#allocation5], %s1100_s17 }
  0x52   : > { %s416_s16 = scalar_lea.sflag [#allocation6], %s415_s4 }
  0x53   : > { %1460 = dma.done.wait (%p1638_p12), %s416_s16, 128  }
  0x54   : > { %1462 = vsyncadd (%p1638_p12), %s416_s16, 4294967168 }
  0x55   : > { %1464 = dma.done.wait (%p52_p1), [#allocation6], 4096  }
  0x56   : > { %1466 = vsyncadd (%p52_p1), [#allocation6], 4294963200 }
  0x57   : > { %1468 = dma.done.wait (%p52_p1), [#allocation9], 6144  }
  0x58   : > { %1470 = vsyncadd (%p52_p1), [#allocation9], 4294961152 }
  0x59   : > { %1472 = dma.done.wait (%p52_p1), [#allocation12], 2048  }
  0x5a   : > { %1474 = vsyncadd (%p52_p1), [#allocation12], 4294965248  ;;  %v513_v0 = vld [vmem:[#allocation7 + $0xf0] sm:$0xff]  ;;  %v511_v2 = vld [vmem:[#allocation7 + $0xe0] sm:$0xff]  ;;  %s1106_s26 = sshll.u32 %s1698_s15, 4  ;;  %s1116_s11 = sshll.u32 %s1582_s20, 4 }
  0x5b   : > { %v592_v1 = vld [vmem:[#allocation8 + $0xf0] sm:$0xff]  ;;  %521 = vmatpush.msra.mxu0 %v513_v0  ;;  %v590_v3 = vld [vmem:[#allocation8 + $0xe0] sm:$0xff]  ;;  %v514_v15 = vld [vmem:[#allocation7 + $0xf8] sm:$0xff]  ;;  %s952_s2 = scalar_lea.hbm %s1897_s10, %s1116_s11  ;;  %s481_s17 = scalar_lea.vmem [#allocation13], %s1106_s26 }
  0x5c   : > { %600 = vmatpush.msra.mxu2 %v592_v1  ;;  %v509_v4 = vld [vmem:[#allocation7 + $0xd0] sm:$0xff]  ;;  %v507_v6 = vld [vmem:[#allocation7 + $0xc0] sm:$0xff]  ;;  %541 = vmatpush.msra.mxu1 %v514_v15  ;;  %v512_v35 = vld [vmem:[#allocation7 + $0xe8] sm:$0xff]  ;;  %s954_s30 = sshll.u32 %s481_s17, 4  ;;  %s941_s20 = scalar_lea.sflag [#allocation4], %s1698_s15  ;;  %s955_s30 = int_to_ptr.vmem [resolvable:$true] %s954_s30 }
  0x5d   : > { %v588_v5 = vld [vmem:[#allocation8 + $0xd0] sm:$0xff]  ;;  %522 = vmatpush.msra.mxu0 %v511_v2  ;;  %v586_v7 = vld [vmem:[#allocation8 + $0xc0] sm:$0xff]  ;;  %v510_v36 = vld [vmem:[#allocation7 + $0xd8] sm:$0xff]  ;;  %s1431_s29 = scalar_lea.hbm %s1897_s10, 32 }
  0x5e   : > { %601 = vmatpush.msra.mxu2 %v590_v3  ;;  %v505_v8 = vld [vmem:[#allocation7 + $0xb0] sm:$0xff]  ;;  %v503_v10 = vld [vmem:[#allocation7 + $0xa0] sm:$0xff]  ;;  %542 = vmatpush.msra.mxu1 %v512_v35  ;;  %v508_v37 = vld [vmem:[#allocation7 + $0xc8] sm:$0xff] }
  0x5f   : > { %523 = vmatpush.msra.mxu0 %v509_v4  ;;  %v584_v9 = vld [vmem:[#allocation8 + $0xb0] sm:$0xff]  ;;  %v582_v11 = vld [vmem:[#allocation8 + $0xa0] sm:$0xff]  ;;  %v506_v38 = vld [vmem:[#allocation7 + $0xb8] sm:$0xff] }
  0x60   : > { %602 = vmatpush.msra.mxu2 %v588_v5  ;;  %v501_v12 = vld [vmem:[#allocation7 + $0x90] sm:$0xff]  ;;  %v499_v14 = vld [vmem:[#allocation7 + $0x80] sm:$0xff]  ;;  %543 = vmatpush.msra.mxu1 %v510_v36  ;;  %v504_v39 = vld [vmem:[#allocation7 + $0xa8] sm:$0xff] }
  0x61   : > { %524 = vmatpush.msra.mxu0 %v507_v6  ;;  %v580_v13 = vld [vmem:[#allocation8 + $0x90] sm:$0xff]  ;;  %v578_v16 = vld [vmem:[#allocation8 + $0x80] sm:$0xff]  ;;  %v502_v40 = vld [vmem:[#allocation7 + $0x98] sm:$0xff] }
  0x62   : > { %603 = vmatpush.msra.mxu2 %v586_v7  ;;  %v497_v17 = vld [vmem:[#allocation7 + $0x70] sm:$0xff]  ;;  %v495_v19 = vld [vmem:[#allocation7 + $0x60] sm:$0xff]  ;;  %544 = vmatpush.msra.mxu1 %v508_v37  ;;  %v500_v41 = vld [vmem:[#allocation7 + $0x88] sm:$0xff] }
  0x63   : > { %525 = vmatpush.msra.mxu0 %v505_v8  ;;  %v576_v18 = vld [vmem:[#allocation8 + $0x70] sm:$0xff]  ;;  %v574_v20 = vld [vmem:[#allocation8 + $0x60] sm:$0xff]  ;;  %v498_v42 = vld [vmem:[#allocation7 + $0x78] sm:$0xff] }
  0x64   : > { %604 = vmatpush.msra.mxu2 %v584_v9  ;;  %v493_v21 = vld [vmem:[#allocation7 + $0x50] sm:$0xff]  ;;  %v491_v23 = vld [vmem:[#allocation7 + $0x40] sm:$0xff]  ;;  %545 = vmatpush.msra.mxu1 %v506_v38  ;;  %v496_v43 = vld [vmem:[#allocation7 + $0x68] sm:$0xff] }
  0x65   : > { %526 = vmatpush.msra.mxu0 %v503_v10  ;;  %v572_v22 = vld [vmem:[#allocation8 + $0x50] sm:$0xff]  ;;  %v570_v24 = vld [vmem:[#allocation8 + $0x40] sm:$0xff]  ;;  %v494_v44 = vld [vmem:[#allocation7 + $0x58] sm:$0xff] }
  0x66   : > { %605 = vmatpush.msra.mxu2 %v582_v11  ;;  %v489_v25 = vld [vmem:[#allocation7 + $0x30] sm:$0xff]  ;;  %v487_v27 = vld [vmem:[#allocation7 + $0x20] sm:$0xff]  ;;  %546 = vmatpush.msra.mxu1 %v504_v39  ;;  %v492_v45 = vld [vmem:[#allocation7 + $0x48] sm:$0xff] }
  0x67   : > { %527 = vmatpush.msra.mxu0 %v501_v12  ;;  %v568_v26 = vld [vmem:[#allocation8 + $0x30] sm:$0xff]  ;;  %v566_v28 = vld [vmem:[#allocation8 + $0x20] sm:$0xff]  ;;  %v490_v46 = vld [vmem:[#allocation7 + $0x38] sm:$0xff] }
  0x68   : > { %606 = vmatpush.msra.mxu2 %v580_v13  ;;  %v485_v29 = vld [vmem:[#allocation7 + $0x10] sm:$0xff]  ;;  %v483_v31 = vld [vmem:[#allocation7] sm:$0xff]  ;;  %547 = vmatpush.msra.mxu1 %v502_v40  ;;  %v779_v47 = vld [vmem:[#allocation10 + $0x78] sm:$0xff] }
  0x69   : > { %528 = vmatpush.msra.mxu0 %v499_v14  ;;  %v564_v30 = vld [vmem:[#allocation8 + $0x10] sm:$0xff]  ;;  %v562_v32 = vld [vmem:[#allocation8] sm:$0xff]  ;;  %v488_v48 = vld [vmem:[#allocation7 + $0x28] sm:$0xff] }
  0x6a   : > { %607 = vmatpush.msra.mxu2 %v578_v16  ;;  %v482_v33 = vld [vmem:[%s1702_s19] sm:$0xff]  ;;  %v1729_v34 = vld [vmem:[%s1709_s21] sm:$0xff]  ;;  %548 = vmatpush.msra.mxu1 %v500_v41  ;;  %s956_s19 = sshll.u32 %s952_s2, 4  ;;  %s957_s19 = int_to_ptr.hbm [resolvable:$true] %s956_s19 }
  0x6b   : > { %529 = vmatpush.msra.mxu0 %v497_v17  ;;  %v1735_v49 = vld [vmem:[%s1890_s3] sm:$0x3]  ;;  %v778_v50 = vld [vmem:[#allocation10 + $0x70] sm:$0xff]  ;;  %v486_v51 = vld [vmem:[#allocation7 + $0x18] sm:$0xff]  ;;  %s1425_s4 = sshra.s32 %s957_s19, 4  ;;  %s1426_s4 = int_to_ptr.hbm [resolvable:$true] %s1425_s4 }
  0x6c   : > { %608 = vmatpush.msra.mxu2 %v576_v18  ;;  %549 = vmatpush.msra.mxu1 %v498_v42  ;;  %v777_v52 = vld [vmem:[#allocation10 + $0x68] sm:$0xff]  ;;  %v517_v53 = vperm.slane %v1735_v49, 0  ;;  %v776_v55 = vld [vmem:[#allocation10 + $0x60] sm:$0xff]  ;;  %v863_v56 = vld [vmem:[#allocation11 + $0x78] sm:$0xff]  ;;  %s1427_s16 = scalar_lea.hbm %s1426_s4, 16  ;;  %p1432_p7 = scmp.lt.s32.totalorder %s1426_s4, %s1897_s10 }
  0x6d   : > { %530 = vmatpush.msra.mxu0 %v495_v19  ;;  %v484_v54 = vld [vmem:[#allocation7 + $0x8] sm:$0xff]  ;;  %v1741_v57 = vld [vmem:[%s1892_s5] sm:$0x3]  ;;  %v593_v59 = vld [vmem:[#allocation8 + $0xf8] sm:$0xff]  ;;  %p1428_p1 = scmp.ne.s32.totalorder %s1426_s4, %s1427_s16  ;;  %p1433_p9 = scmp.lt.s32.totalorder %s1431_s29, %s1427_s16 }
  0x6e   : > { %609 = vmatpush.msra.mxu2 %v574_v20  ;;  %550 = vmatpush.msra.mxu1 %v496_v43  ;;  %v775_v60 = vld [vmem:[#allocation10 + $0x58] sm:$0xff]  ;;  %v862_v61 = vld [vmem:[#allocation11 + $0x70] sm:$0xff]  ;;  %v591_v63 = vld [vmem:[#allocation8 + $0xe8] sm:$0xff]  ;;  %v596_v3 = vperm.slane %v1741_v57, 0 }
  0x6f   : > { %531 = vmatpush.msra.mxu0 %v493_v21  ;;  %620 = vmatpush.msra.mxu3 %v593_v59  ;;  %v774_v0 = vld [vmem:[#allocation10 + $0x50] sm:$0xff]  ;;  %v861_v1 = vld [vmem:[#allocation11 + $0x68] sm:$0xff]  ;;  %v589_v4 = vld [vmem:[#allocation8 + $0xd8] sm:$0xff]  ;;  %p1429_p3 = pnand %p1428_p1, %p1645_p4  ;;  %p1434_p8 = por %p1433_p9, %p1432_p7 }
  0x70   : > { %610 = vmatpush.msra.mxu2 %v572_v22  ;;  %551 = vmatpush.msra.mxu1 %v494_v44  ;;  %v773_v5 = vld [vmem:[#allocation10 + $0x48] sm:$0xff]  ;;  %v860_v6 = vld [vmem:[#allocation11 + $0x60] sm:$0xff]  ;;  %v859_v11 = vld [vmem:[#allocation11 + $0x58] sm:$0xff] }
  0x71   : > { %532 = vmatpush.msra.mxu0 %v491_v23  ;;  %621 = vmatpush.msra.mxu3 %v591_v63  ;;  %v587_v9 = vld [vmem:[#allocation8 + $0xc8] sm:$0xff]  ;;  %v772_v10 = vld [vmem:[#allocation10 + $0x40] sm:$0xff]  ;;  %v585_v14 = vld [vmem:[#allocation8 + $0xb8] sm:$0xff]  ;;  %p1430_p12 = pneg %p1429_p3 }
  0x72   : > { %611 = vmatpush.msra.mxu2 %v570_v24  ;;  %552 = vmatpush.msra.mxu1 %v492_v45  ;;  %v771_v15 = vld [vmem:[#allocation10 + $0x38] sm:$0xff]  ;;  %v858_v16 = vld [vmem:[#allocation11 + $0x50] sm:$0xff]  ;;  %v583_v20 = vld [vmem:[#allocation8 + $0xa8] sm:$0xff] }
  0x73   : > { %533 = vmatpush.msra.mxu0 %v489_v25  ;;  %622 = vmatpush.msra.mxu3 %v589_v4  ;;  %v770_v21 = vld [vmem:[#allocation10 + $0x30] sm:$0xff]  ;;  %v857_v22 = vld [vmem:[#allocation11 + $0x48] sm:$0xff]  ;;  %v855_v35 = vld [vmem:[#allocation11 + $0x38] sm:$0xff]  ;;  %p1435_p10 = pnand %p1434_p8, %p1430_p12 }
  0x74   : > { %612 = vmatpush.msra.mxu2 %v568_v26  ;;  %553 = vmatpush.msra.mxu1 %v490_v46  ;;  %v581_v26 = vld [vmem:[#allocation8 + $0x98] sm:$0xff]  ;;  %v854_v43 = vld [vmem:[#allocation11 + $0x30] sm:$0xff]  ;;  %v575_v46 = vld [vmem:[#allocation8 + $0x68] sm:$0xff] }
  0x75   : > { %534 = vmatpush.msra.mxu0 %v487_v27  ;;  %623 = vmatpush.msra.mxu3 %v587_v9  ;;  %v769_v27 = vld [vmem:[#allocation10 + $0x28] sm:$0xff]  ;;  %v577_v40 = vld [vmem:[#allocation8 + $0x78] sm:$0xff]  ;;  %v850_v4 = vld [vmem:[#allocation11 + $0x10] sm:$0xff] }
  0x76   : > { %613 = vmatpush.msra.mxu2 %v566_v28  ;;  %554 = vmatpush.msra.mxu1 %v488_v48  ;;  %v856_v28 = vld [vmem:[#allocation11 + $0x40] sm:$0xff]  ;;  %v767_v41 = vld [vmem:[#allocation10 + $0x18] sm:$0xff]  ;;  %v571_v59 = vld [vmem:[#allocation8 + $0x48] sm:$0xff] }
  0x77   : > { %535 = vmatpush.msra.mxu0 %v485_v29  ;;  %624 = vmatpush.msra.mxu3 %v585_v14  ;;  %v849_v9 = vld [vmem:[#allocation11 + $0x8] sm:$0xff] }
  0x78   : > { %614 = vmatpush.msra.mxu2 %v564_v30  ;;  %555 = vmatpush.msra.mxu1 %v486_v51 }
  0x79   : > { %536 = vmatpush.msra.mxu0 %v483_v31  ;;  %625 = vmatpush.msra.mxu3 %v583_v20  ;;  %v563_v20 = vld [vmem:[#allocation8 + $0x8] sm:$0xff] }
  0x7a   : > { %615 = vmatpush.msra.mxu2 %v562_v32  ;;  %537 = vmatmul.f32.vlgmr.msra.gmra.mxu0 %v482_v33  ;;  %v579_v32 = vld [vmem:[#allocation8 + $0x88] sm:$0xff] }
  0x7b   : > { %616 = vmatmul.f32.vlgmr.msra.gmra.mxu2 %v1729_v34  ;;  %784 = vmatpush.msrb.mxu0 %v779_v47  ;;  %v766_v47 = vld [vmem:[#allocation10 + $0x10] sm:$0xff] }
  0x7c   : > { %556 = vmatpush.msra.mxu1 %v484_v54  ;;  %626 = vmatpush.msra.mxu3 %v581_v26  ;;  %v573_v54 = vld [vmem:[#allocation8 + $0x58] sm:$0xff] }
  0x7d   : > { %785 = vmatpush.msrb.mxu0 %v778_v50  ;;  %557 = vmatmul.f32.vlgmr.msra.gmra.mxu1 %v482_v33  ;;  %v768_v33 = vld [vmem:[#allocation10 + $0x20] sm:$0xff]  ;;  %v853_v50 = vld [vmem:[#allocation11 + $0x28] sm:$0xff] }
  0x7e   : > { %868 = vmatpush.msrb.mxu1 %v863_v56  ;;  %627 = vmatpush.msra.mxu3 %v579_v32  ;;  %v852_v56 = vld [vmem:[#allocation11 + $0x20] sm:$0xff] }
  0x7f   : > { %786 = vmatpush.msrb.mxu0 %v777_v52 }
  0x80   : > { %869 = vmatpush.msrb.mxu1 %v862_v61  ;;  %628 = vmatpush.msra.mxu3 %v577_v40  ;;  %v851_v61 = vld [vmem:[#allocation11 + $0x18] sm:$0xff] }
  0x81   : > { %787 = vmatpush.msrb.mxu0 %v776_v55  ;;  %v765_v55 = vld [vmem:[#allocation10 + $0x8] sm:$0xff] }
  0x82   : > { %870 = vmatpush.msrb.mxu1 %v861_v1  ;;  %629 = vmatpush.msra.mxu3 %v575_v46 }
  0x83   : > { %788 = vmatpush.msrb.mxu0 %v775_v60  ;;  %v764_v60 = vld [vmem:[#allocation10] sm:$0xff] }
  0x84   : > { %871 = vmatpush.msrb.mxu1 %v860_v6  ;;  %630 = vmatpush.msra.mxu3 %v573_v54 }
  0x85   : > { %789 = vmatpush.msrb.mxu0 %v774_v0  ;;  %v569_v0 = vld [vmem:[#allocation8 + $0x38] sm:$0xff] }
  0x86   : > { %872 = vmatpush.msrb.mxu1 %v859_v11  ;;  %631 = vmatpush.msra.mxu3 %v571_v59  ;;  %v565_v11 = vld [vmem:[#allocation8 + $0x18] sm:$0xff] }
  0x87   : > { %790 = vmatpush.msrb.mxu0 %v773_v5 }
  0x88   : > { %873 = vmatpush.msrb.mxu1 %v858_v16  ;;  %632 = vmatpush.msra.mxu3 %v569_v0  ;;  %v848_v16 = vld [vmem:[#allocation11] sm:$0xff] }
  0x89   : > { %791 = vmatpush.msrb.mxu0 %v772_v10 }
  0x8a   : > { %874 = vmatpush.msrb.mxu1 %v857_v22 }
  0x8b   : > { %792 = vmatpush.msrb.mxu0 %v771_v15 }
  0x8c   : > { %875 = vmatpush.msrb.mxu1 %v856_v28 }
  0x8d   : > { %793 = vmatpush.msrb.mxu0 %v770_v21 }
  0x8e   : > { %876 = vmatpush.msrb.mxu1 %v855_v35 }
  0x8f   : > { %794 = vmatpush.msrb.mxu0 %v769_v27 }
  0x90   : > { %877 = vmatpush.msrb.mxu1 %v854_v43 }
  0x91   : > { %795 = vmatpush.msrb.mxu0 %v768_v33 }
  0x92   : > { %878 = vmatpush.msrb.mxu1 %v853_v50 }
  0x93   : > { %796 = vmatpush.msrb.mxu0 %v767_v41 }
  0x94   : > { %879 = vmatpush.msrb.mxu1 %v852_v56 }
  0x95   : > { %797 = vmatpush.msrb.mxu0 %v766_v47 }
  0x96   : > { %880 = vmatpush.msrb.mxu1 %v851_v61 }
  0x97   : > { %798 = vmatpush.msrb.mxu0 %v765_v55 }
  0x98   : > { %881 = vmatpush.msrb.mxu1 %v850_v4 }
  0x99   : > { %799 = vmatpush.msrb.mxu0 %v764_v60 }
  0x9a   : > { %882 = vmatpush.msrb.mxu1 %v849_v9 }
  0x9c   : > { %883 = vmatpush.msrb.mxu1 %v848_v16 }
  0xf7   : > { %v538_v58 = vpop.f32.mrf.mxu0 }
  0xf8   : > { %v1743_v62 = vadd.f32 %v538_v58, %v517_v53 }
  0xfa   : > { %v1746_v2 = vmul.f32 0.70710677, %v1743_v62 }
  0xfc   : > { %v642_v7 = vmul.f32 %v1746_v2, %v1746_v2 }
  0xfe   : > { %v617_v8 = vpop.f32.mrf.mxu2  ;;  %v1751_v12 = vmin.f32 %v642_v7, 16.0  ;;  %v567_v7 = vld [vmem:[#allocation8 + $0x28] sm:$0xff] }
  0xff   : > { %v1753_v13 = vadd.f32 %v617_v8, %v596_v3  ;;  %633 = vmatpush.msra.mxu3 %v567_v7  ;;  %v597_v7 = vperm.slane %v1741_v57, 1 }
 0x100   : > { %v644_v17 = vmul.f32 2.1237322e-06, %v1751_v12  ;;  %v655_v18 = vmul.f32 3.8918573e-05, %v1751_v12 }
 0x101   : > { %v1758_v19 = vmul.f32 0.70710677, %v1753_v13  ;;  %634 = vmatpush.msra.mxu3 %v565_v11  ;;  %v702_v61 = vmul.f32 0.5, %v1753_v13  ;;  %v1214_v13 = vld [vmem:[%s1896_s9] ss:$0 sm:$0xff] }
 0x102   : > { %v645_v23 = vadd.f32 0.00028619796, %v644_v17  ;;  %v656_v24 = vadd.f32 0.001143296, %v655_v18 }
 0x103   : > { %v704_v25 = vmul.f32 %v1758_v19, %v1758_v19  ;;  %635 = vmatpush.msra.mxu3 %v563_v20 }
 0x104   : > { %v646_v29 = vmul.f32 %v645_v23, %v1751_v12  ;;  %v657_v30 = vmul.f32 %v656_v24, %v1751_v12  ;;  %636 = vmatmul.f32.vlgmr.msra.gmra.mxu3 %v1729_v34 }
 0x105   : > { %v1764_v31 = vmin.f32 %v704_v25, 16.0 }
 0x106   : > { %v647_v36 = vadd.f32 0.0036580483, %v646_v29  ;;  %v658_v37 = vadd.f32 0.014752088, %v657_v30 }
 0x107   : > { %v706_v38 = vmul.f32 2.1237322e-06, %v1764_v31  ;;  %v717_v39 = vmul.f32 3.8918573e-05, %v1764_v31 }
 0x108   : > { %v659_v42 = vmul.f32 %v658_v37, %v1751_v12  ;;  %v648_v51 = vmul.f32 %v647_v36, %v1751_v12 }
 0x109   : > { %v707_v44 = vadd.f32 0.00028619796, %v706_v38  ;;  %v718_v45 = vadd.f32 0.001143296, %v717_v39 }
 0x10a   : > { %v660_v48 = vadd.f32 0.112945676, %v659_v42  ;;  %v649_v5 = vadd.f32 0.05243302, %v648_v51 }
 0x10b   : > { %v708_v52 = vmul.f32 %v707_v44, %v1764_v31  ;;  %v719_v53 = vmul.f32 %v718_v45, %v1764_v31 }
 0x10c   : > { %v661_v58 = vmul.f32 %v660_v48, %v1751_v12  ;;  %v650_v17 = vmul.f32 %v649_v5, %v1751_v12 }
 0x10d   : > { %v720_v63 = vadd.f32 0.014752088, %v719_v53  ;;  %v709_v3 = vadd.f32 0.0036580483, %v708_v52  ;;  %v640_v53 = vmul.f32 0.5, %v1743_v62 }
 0x10e   : > { %v662_v1 = vadd.f32 0.4994258, %v661_v58  ;;  %v651_v23 = vadd.f32 0.18741608, %v650_v17  ;;  %v1213_v62 = vld [vmem:[%s1894_s7] ss:$0 sm:$0xff] }
 0x10f   : > { %v721_v6 = vmul.f32 %v720_v63, %v1764_v31  ;;  %v710_v15 = vmul.f32 %v709_v3, %v1764_v31  ;;  %v558_v3 = vpop.f32.mrf.mxu1 }
 0x110   : > { %v663_v8 = vmul.f32 %v662_v1, %v1751_v12  ;;  %v652_v28 = vmul.f32 %v651_v23, %v1751_v12  ;;  %v518_v1 = vperm.slane %v1735_v49, 1 }
 0x111   : > { %v722_v10 = vadd.f32 0.112945676, %v721_v6  ;;  %v711_v22 = vadd.f32 0.05243302, %v710_v15 }
 0x112   : > { %v664_v14 = vadd.f32 1.0, %v663_v8  ;;  %v653_v35 = vadd.f32 1.1283791, %v652_v28  ;;  %v559_v4 = vadd.f32 %v558_v3, %v518_v1 }
 0x113   : > { %v723_v18 = vmul.f32 %v722_v10, %v1764_v31  ;;  %v712_v27 = vmul.f32 %v711_v22, %v1764_v31 }
 0x114   : > { %1215 = vrcp.f32 %v664_v14  ;;  %v676_v32 = vand.u32 2147483648, %v664_v14  ;;  %v674_v37 = vand.u32 2147483647, %v664_v14  ;;  %vm670_vm1 = vweird.f32 %v664_v14 }
 0x115   : > { %v724_v21 = vadd.f32 0.4994258, %v723_v18  ;;  %v713_v33 = vadd.f32 0.18741608, %v712_v27  ;;  %v654_v42 = vmul.f32 %v653_v35, %v1746_v2  ;;  %v684_v49 = vsub.f32 0.0, %v559_v4 }
 0x116   : > { %v677_v34 = vor.u32 1.1754944e-38, %v676_v32  ;;  %vm675_vm3 = vcmp.eq.f32.partialorder %v674_v37, 8.507059e+37 }
 0x117   : > { %v725_v24 = vmul.f32 %v724_v21, %v1764_v31  ;;  %v714_v40 = vmul.f32 %v713_v33, %v1764_v31  ;;  %v685_v16 = vmul.f32 1.442695, %v684_v49 }
 0x119   : > { %v726_v25 = vadd.f32 1.0, %v725_v24  ;;  %v715_v47 = vadd.f32 1.1283791, %v714_v40 }
 0x11a   : > { %v1216_v26 = vpop.eup %1215 }
 0x11b   : > { %v666_v29 = vmul.f32 %v1216_v26, %v664_v14  ;;  %1217 = vrcp.f32 %v726_v25  ;;  %vm671_vm0 = vweird.f32 %v1216_v26  ;;  %v738_v46 = vand.u32 2147483648, %v726_v25 }
 0x11c   : > { %vm672_vm2 = vmor %vm670_vm1, %vm671_vm0  ;;  %v736_v50 = vand.u32 2147483647, %v726_v25  ;;  %vm732_vm5 = vweird.f32 %v726_v25  ;;  %v716_v2 = vmul.f32 %v715_v47, %v1758_v19  ;;  %1219 = vpow2.f32 %v685_v16 }
 0x11d   : > { %v667_v30 = vsub.f32 1.0, %v666_v29  ;;  %v739_v31 = vor.u32 1.1754944e-38, %v738_v46 }
 0x11e   : > { %vm737_vm7 = vcmp.eq.f32.partialorder %v736_v50, 8.507059e+37 }
 0x11f   : > { %v668_v36 = vmul.f32 %v1216_v26, %v667_v30 }
 0x121   : > { %v1218_v38 = vpop.eup %1217  ;;  %v669_v39 = vadd.f32 %v1216_v26, %v668_v36 }
 0x122   : > { %v728_v41 = vmul.f32 %v1218_v38, %v726_v25  ;;  %vm733_vm4 = vweird.f32 %v1218_v38  ;;  %v1220_v37 = vpop.eup %1219 }
 0x123   : > { %v673_v12 = vsel %vm672_vm2, %v1216_v26, %v669_v39  ;;  %vm734_vm6 = vmor %vm732_vm5, %vm733_vm4 }
 0x124   : > { %v678_v43 = vsel %vm675_vm3, %v677_v34, %v673_v12  ;;  %v729_v44 = vsub.f32 1.0, %v728_v41 }
 0x125   : > { %v679_v45 = vmul.f32 %v678_v43, %v654_v42  ;;  %v1809_v42 = vadd.f32 1.0, %v1220_v37 }
 0x126   : > { %v730_v48 = vmul.f32 %v1218_v38, %v729_v44 }
 0x127   : > { %v1107_v51 = vclamps-f32 %v679_v45, 1.0  ;;  %vm693_vm12 = vweird.f32 %v1809_v42 }
 0x128   : > { %v731_v52 = vadd.f32 %v1218_v38, %v730_v48 }
 0x129   : > { %v682_v54 = vadd.f32 1.0, %v1107_v51 }
 0x12a   : > { %v735_v55 = vsel %vm734_vm6, %v1218_v38, %v731_v52 }
 0x12b   : > { %v740_v56 = vsel %vm737_vm7, %v739_v31, %v735_v55  ;;  %v683_v58 = vmul.f32 %v682_v54, %v640_v53 }
 0x12c   : > { %v741_v59 = vmul.f32 %v740_v56, %v716_v2 }
 0x12d   : > { %800 = vmatmul.f32.vlgmr.msrb.gmra.mxu0 %v683_v58 }
 0x12e   : > { %v1108_v60 = vclamps-f32 %v741_v59, 1.0 }
 0x130   : > { %v744_v63 = vadd.f32 1.0, %v1108_v60 }
 0x132   : > { %v745_v0 = vmul.f32 %v744_v63, %v702_v61 }
 0x134   : > { %884 = vmatmul.f32.vlgmr.msrb.gmra.mxu1 %v745_v0 }
 0x187   : > { %v637_v8 = vpop.f32.mrf.mxu3 }
 0x188   : > { %v638_v14 = vadd.f32 %v637_v8, %v597_v7 }
 0x18a   : > { %v746_v22 = vsub.f32 0.0, %v638_v14 }
 0x18c   : > { %v747_v28 = vmul.f32 1.442695, %v746_v22 }
 0x18e   : > { %1221 = vpow2.f32 %v747_v28 }
 0x18f   : > { %1223 = vrcp.f32 %v1809_v42 }
 0x194   : > { %v1222_v47 = vpop.eup %1221 }
 0x195   : > { %v1812_v54 = vadd.f32 1.0, %v1222_v47  ;;  %v1814_v56 = vpop.eup %1223 }
 0x196   : > { %v689_v63 = vmul.f32 %v1814_v56, %v1809_v42  ;;  %vm694_vm13 = vweird.f32 %v1814_v56 }
 0x197   : > { %vm1830_vm15 = vmor %vm693_vm12, %vm694_vm13  ;;  %vm755_vm3 = vweird.f32 %v1812_v54 }
 0x198   : > { %v690_v4 = vsub.f32 1.0, %v689_v63 }
 0x1aa   : > { %v801_v19 = vpop.f32.mrf.mxu0 }
 0x1ab   : > { %v1791_v5 = vadd.f32 %v1213_v62, %v801_v19 }
 0x1ad   : > { %v1794_v6 = vmul.f32 0.70710677, %v1791_v5 }
 0x1af   : > { %v806_v9 = vmul.f32 %v1794_v6, %v1794_v6 }
 0x1b1   : > { %v807_v10 = vmin.f32 %v806_v9, 16.0  ;;  %v885_v11 = vpop.f32.mrf.mxu1 }
 0x1b2   : > { %v1802_v15 = vadd.f32 %v1214_v13, %v885_v11 }
 0x1b3   : > { %v808_v17 = vmul.f32 2.1237322e-06, %v807_v10  ;;  %v819_v18 = vmul.f32 3.8918573e-05, %v807_v10 }
 0x1b4   : > { %v1805_v20 = vmul.f32 0.70710677, %v1802_v15 }
 0x1b5   : > { %v809_v57 = vadd.f32 0.00028619796, %v808_v17  ;;  %v820_v21 = vadd.f32 0.001143296, %v819_v18 }
 0x1b6   : > { %v890_v23 = vmul.f32 %v1805_v20, %v1805_v20 }
 0x1b7   : > { %v810_v24 = vmul.f32 %v809_v57, %v807_v10  ;;  %v821_v25 = vmul.f32 %v820_v21, %v807_v10  ;;  %v691_v57 = vmul.f32 %v1814_v56, %v690_v4 }
 0x1b8   : > { %v891_v26 = vmin.f32 %v890_v23, 16.0  ;;  %v697_v23 = vand.u32 2147483647, %v1809_v42 }
 0x1b9   : > { %v822_v27 = vadd.f32 0.014752088, %v821_v25  ;;  %v811_v29 = vadd.f32 0.0036580483, %v810_v24 }
 0x1ba   : > { %v892_v30 = vmul.f32 2.1237322e-06, %v891_v26  ;;  %v903_v32 = vmul.f32 3.8918573e-05, %v891_v26  ;;  %vm1834_vm0 = vcmp.eq.f32.partialorder %v697_v23, 8.507059e+37 }
 0x1bb   : > { %v823_v33 = vmul.f32 %v822_v27, %v807_v10  ;;  %v812_v39 = vmul.f32 %v811_v29, %v807_v10 }
 0x1bc   : > { %v893_v35 = vadd.f32 0.00028619796, %v892_v30  ;;  %v904_v36 = vadd.f32 0.001143296, %v903_v32 }
 0x1bd   : > { %v824_v38 = vadd.f32 0.112945676, %v823_v33  ;;  %v813_v45 = vadd.f32 0.05243302, %v812_v39  ;;  %v692_v33 = vadd.f32 %v1814_v56, %v691_v57 }
 0x1be   : > { %v894_v34 = vmul.f32 %v893_v35, %v891_v26  ;;  %v905_v40 = vmul.f32 %v904_v36, %v891_v26 }
 0x1bf   : > { %v825_v41 = vmul.f32 %v824_v38, %v807_v10  ;;  %v814_v53 = vmul.f32 %v813_v45, %v807_v10 }
 0x1c0   : > { %v906_v12 = vadd.f32 0.014752088, %v905_v40  ;;  %v895_v44 = vadd.f32 0.0036580483, %v894_v34  ;;  %v804_v34 = vmul.f32 0.5, %v1791_v5  ;;  %v761_v5 = vand.u32 2147483648, %v1812_v54 }
 0x1c1   : > { %v826_v43 = vadd.f32 0.4994258, %v825_v41  ;;  %v815_v58 = vadd.f32 0.18741608, %v814_v53 }
 0x1c2   : > { %v907_v46 = vmul.f32 %v906_v12, %v891_v26  ;;  %v896_v52 = vmul.f32 %v895_v44, %v891_v26  ;;  %v762_v53 = vor.u32 1.1754944e-38, %v761_v5 }
 0x1c3   : > { %v827_v48 = vmul.f32 %v826_v43, %v807_v10  ;;  %v816_v1 = vmul.f32 %v815_v58, %v807_v10  ;;  %v696_v43 = vsel %vm1830_vm15, %v1814_v56, %v692_v33 }
 0x1c4   : > { %v908_v50 = vadd.f32 0.112945676, %v907_v46  ;;  %v897_v55 = vadd.f32 0.05243302, %v896_v52  ;;  %v888_v52 = vmul.f32 0.5, %v1802_v15 }
 0x1c5   : > { %v828_v51 = vadd.f32 1.0, %v827_v48  ;;  %v817_v8 = vadd.f32 1.1283791, %v816_v1 }
 0x1c6   : > { %v909_v31 = vmul.f32 %v908_v50, %v891_v26  ;;  %v898_v0 = vmul.f32 %v897_v55, %v891_v26 }
 0x1c7   : > { %1225 = vrcp.f32 %v828_v51  ;;  %v840_v7 = vand.u32 2147483648, %v828_v51  ;;  %v838_v9 = vand.u32 2147483647, %v828_v51  ;;  %vm834_vm9 = vweird.f32 %v828_v51 }
 0x1c8   : > { %v910_v2 = vadd.f32 0.4994258, %v909_v31  ;;  %1227 = vrcp.f32 %v1812_v54  ;;  %v899_v13 = vadd.f32 0.18741608, %v898_v0  ;;  %v818_v21 = vmul.f32 %v817_v8, %v1794_v6 }
 0x1c9   : > { %v841_v10 = vor.u32 1.1754944e-38, %v840_v7  ;;  %vm839_vm11 = vcmp.eq.f32.partialorder %v838_v9, 8.507059e+37  ;;  %v699_v6 = vand.u32 2147483648, %v1809_v42 }
 0x1ca   : > { %v911_v59 = vmul.f32 %v910_v2, %v891_v26  ;;  %v900_v17 = vmul.f32 %v899_v13, %v891_v26 }
 0x1cb   : > { %v700_v44 = vor.u32 1.1754944e-38, %v699_v6 }
 0x1cc   : > { %v912_v60 = vadd.f32 1.0, %v911_v59  ;;  %v901_v30 = vadd.f32 1.1283791, %v900_v17 }
 0x1cd   : > { %v1226_v61 = vpop.eup %1225 }
 0x1ce   : > { %v830_v62 = vmul.f32 %v1226_v61, %v828_v51  ;;  %1229 = vrcp.f32 %v912_v60  ;;  %v1819_v3 = vpop.eup %1227  ;;  %vm835_vm8 = vweird.f32 %v1226_v61  ;;  %v924_v29 = vand.u32 2147483648, %v912_v60 }
 0x1cf   : > { %v751_v11 = vmul.f32 %v1819_v3, %v1812_v54  ;;  %vm836_vm10 = vmor %vm834_vm9, %vm835_vm8  ;;  %v922_v32 = vand.u32 2147483647, %v912_v60  ;;  %vm918_vm1 = vweird.f32 %v912_v60  ;;  %v902_v42 = vmul.f32 %v901_v30, %v1805_v20 }
 0x1d0   : > { %v831_v19 = vsub.f32 1.0, %v830_v62  ;;  %v925_v41 = vor.u32 1.1754944e-38, %v924_v29  ;;  %vm756_vm5 = vweird.f32 %v1819_v3  ;;  %v759_v20 = vand.u32 2147483647, %v1812_v54 }
 0x1d1   : > { %v752_v27 = vsub.f32 1.0, %v751_v11  ;;  %vm923_vm4 = vcmp.eq.f32.partialorder %v922_v32, 8.507059e+37  ;;  %vm757_vm6 = vmor %vm755_vm3, %vm756_vm5  ;;  %v701_v51 = vsel %vm1834_vm0, %v700_v44, %v696_v43 }
 0x1d2   : > { %v832_v49 = vmul.f32 %v1226_v61, %v831_v19  ;;  %vm760_vm7 = vcmp.eq.f32.partialorder %v759_v20, 8.507059e+37 }
 0x1d3   : > { %v753_v39 = vmul.f32 %v1819_v3, %v752_v27 }
 0x1d4   : > { %v1230_v14 = vpop.eup %1229  ;;  %v833_v16 = vadd.f32 %v1226_v61, %v832_v49 }
 0x1d5   : > { %v914_v18 = vmul.f32 %v1230_v14, %v912_v60  ;;  %vm919_vm14 = vweird.f32 %v1230_v14  ;;  %v754_v48 = vadd.f32 %v1819_v3, %v753_v39 }
 0x1d6   : > { %v837_v22 = vsel %vm836_vm10, %v1226_v61, %v833_v16  ;;  %vm920_vm2 = vmor %vm918_vm1, %vm919_vm14 }
 0x1d7   : > { %v842_v24 = vsel %vm839_vm11, %v841_v10, %v837_v22  ;;  %v915_v25 = vsub.f32 1.0, %v914_v18  ;;  %v758_v55 = vsel %vm757_vm6, %v1819_v3, %v754_v48 }
 0x1d8   : > { %v843_v28 = vmul.f32 %v842_v24, %v818_v21  ;;  %v763_v54 = vsel %vm760_vm7, %v762_v53, %v758_v55 }
 0x1d9   : > { %v916_v26 = vmul.f32 %v1230_v14, %v915_v25 }
 0x1da   : > { %v1109_v35 = vclamps-f32 %v843_v28, 1.0 }
 0x1db   : > { %v917_v38 = vadd.f32 %v1230_v14, %v916_v26 }
 0x1dc   : > { %v846_v40 = vadd.f32 1.0, %v1109_v35 }
 0x1dd   : > { %v921_v12 = vsel %vm920_vm2, %v1230_v14, %v917_v38 }
 0x1de   : > { %v926_v45 = vsel %vm923_vm4, %v925_v41, %v921_v12  ;;  %v847_v46 = vmul.f32 %v846_v40, %v804_v34 }
 0x1df   : > { %v927_v47 = vmul.f32 %v926_v45, %v902_v42 }
 0x1e0   : > { %v932_v31 = vmul.f32 %v847_v46, %v701_v51 }
 0x1e1   : > { %v1110_v50 = vclamps-f32 %v927_v47, 1.0 }
 0x1e2   : > { %v934_v58 = vsub.f32 %v847_v46, %v932_v31 }
 0x1e3   : > { %v930_v2 = vadd.f32 1.0, %v1110_v50 }
 0x1e5   : > { %v931_v56 = vmul.f32 %v930_v2, %v888_v52 }
 0x1e7   : > { %v933_v59 = vmul.f32 %v931_v56, %v763_v54 }
 0x1e9   : > { %v935_v15 = vadd.f32 %v934_v58, %v933_v59  ;;  %v936_v60 = vsub.f32 %v931_v56, %v933_v59 }
 0x1eb   : > { %v937_v61 = vadd.f32 %v936_v60, %v932_v31  ;;  %938 = vst [vmem:[%s481_s17] sm:$0xff] %v935_v15 }
 0x1ed   : > { %939 = vst [vmem:[%s481_s17 + $0x8] sm:$0xff] %v937_v61 }
 0x1ee   : > { %1438 = shalt.err (!%p1435_p10)
}
 0x1ef   : > { %1137 = dma.vmem_to_hbm [thread:$0]  (%p1645_p4), %s955_s30, 256, %s957_s19, %s941_s20  }
 0x1f0 PF: > { %s1928_s25 = sld [smem:[#allocation21_spill]]  ;;  %s968_s23 = sand.u32 1, %s1481_s13  }
 0x1f1   : > { %s969_s24 = scalar_lea.sflag [#allocation4], %s968_s23 }
 0x1f6   : > { %p1929_p11 = scmp.ge.s32.totalorder %s1928_s25, 2 }
 0x1f8   : > { %p1160_p5 = pnand %p1929_p11, %p1649_p6 }
 0x1fa   : > { %p1161_p13 = pneg %p1160_p5 }
 0x1fc   : > { %1476 = dma.done.wait (%p1161_p13), %s969_s24, 256  }
 0x1fd   : > { %1478 = vsyncadd (%p1161_p13), %s969_s24, 4294967040  ;;  %s1930_s16 = sld [smem:[#allocation22_spill]]  ;;  %s1933_s13 = smov %s1485_s14 }
 0x1fe   : > { %s1931_s18 = sld [smem:[#allocation20_spill]] }
 0x1ff   : > { %s1932_s15 = sld [smem:[#allocation23_spill]] }
 0x203   : > { %p28_p0 = scmp.ge.s32.totalorder %s1930_s16, 4  }
 0x204   : > { %s1934_s14 = smov %s1931_s18 }
 0x205   :  { %30 = sbr.rel (!%p28_p0) target bundleno = 14 (0xe), region = 134 }
 0x20a   :  { %975 = vsyncpa [#allocation3], 1 }
 0x20b   :  { %977 = vsyncpa [#allocation3 + $0x1], 1 }
 0x20c   :  { %978 = vsyncpa [#allocation6], 1 }
 0x20d   :  { %980 = vsyncpa [#allocation6 + $0x1], 1 }
 0x20e   :  { %981 = vsyncpa [#allocation9], 1 }
 0x20f   :  { %982 = vsyncpa [#allocation12], 1 }
 0x210   :  { %983 = vsyncpa [#allocation4], 1 }
 0x211   :  { %985 = vsyncpa [#allocation4 + $0x1], 1 }

</bundles_post_ra>
